<compile_context>
chip_gen: v7x
topology: tpu7x:2x2x1
jax: 0.10.0
libtpu: 0.0.40
codegen_flags: <defaults>
</compile_context>

<pallas_src>
import functools

import jax
import jax.numpy as jnp
from jax.experimental import pallas as pl
from jax.experimental.pallas import tpu as pltpu


def _round_up(a: int, m: int) -> int:
    return ((a + m - 1) // m) * m


def _cdiv(a: int, m: int) -> int:
    return (a + m - 1) // m


def _gaussian_filters(sigma, filter_size: int, order: int):
    """Replicates DeepGaussianFilter.get_filters -> (order+1, filter_size)."""
    xl = jnp.linspace(-3.0, 3.0, filter_size, dtype=jnp.float32)
    g0 = jnp.exp(-(xl ** 2) / (2.0 * sigma ** 2.0))
    g0 = g0 / jnp.sum(g0)
    filters = [g0]
    if order >= 1:
        g1 = g0 * xl
        g1 = g1 / jnp.std(g1, ddof=1)      # torch.std is unbiased (ddof=1)
        filters.append(g1)
    if order >= 2:
        g2 = g0 * (xl ** 2 - sigma ** 2)
        g2 = g2 / jnp.std(g2, ddof=1)
        filters.append(g2)
    return jnp.stack(filters)


def _dgf_kernel(xm_ref, xh_ref, f_ref, o_ref, *, n_ch, n_taps, t_tile):
    """One (B_tile, T_tile) output tile of the K-channel 1D cross-correlation.

    xm_ref: (B_tile, T_tile)       VMEM  main time tile
    xh_ref: (1, B_tile, F-1)       VMEM  right halo of this time tile
    f_ref : (K, F)                 SMEM  scalar taps
    o_ref : (B_tile, K, T_tile)    VMEM  output tile in (B, K, T) layout
    """
    xm = xm_ref[...]
    xh = xh_ref[0]
    xp = jnp.concatenate([xm, xh], axis=-1)          # (B_tile, T_tile + F - 1)

    # Taps outermost: each shifted slice is built once and feeds all K accumulators.
    accs = [f_ref[c, 0] * xp[:, 0:t_tile] for c in range(n_ch)]
    for j in range(1, n_taps):
        sl = xp[:, j:j + t_tile]
        for c in range(n_ch):
            accs[c] = accs[c] + f_ref[c, j] * sl

    for c in range(n_ch):
        o_ref[:, c, :] = accs[c]


def deep_gaussian_filter(x, sigma, *, filter_size: int = 11, order: int = 2):
    """x: (B, T) float -> (B, order+1, T) float32 (matches the PyTorch forward)."""
    assert filter_size % 2 == 1 and filter_size > 1
    assert 0 <= order <= 2
    b, t = x.shape
    n = filter_size // 2
    halo = filter_size - 1
    k = order + 1

    # Tile sizes: B_tile multiple of 8, T_tile multiple of 128; capped for v7x VMEM.
    b_tile = min(256, _round_up(b, 8))
    t_tile = min(512, _round_up(t, 128))
    assert t_tile >= halo, "filter too wide for the chosen time tile"
    num_bt = _cdiv(b, b_tile)
    num_tt = _cdiv(t, t_tile)
    b_pad = num_bt * b_tile
    t_main = num_tt * t_tile
    width_ext = (num_tt + 1) * t_tile          # one extra tile so the halo gather is uniform

    # ---- glue (plain JAX): edge pad, zero-fill to the tile grid, halo side-array ----
    x32 = x.astype(jnp.float32)
    xpad = jnp.pad(x32, ((0, b_pad - b), (n, n)), mode="edge")        # (b_pad, t + 2n)
    xext = jnp.pad(xpad, ((0, 0), (0, width_ext - (t + 2 * n))))      # (b_pad, width_ext)
    tail = xext[:, t_tile:t_tile + num_tt * t_tile]
    x_halo = tail.reshape(b_pad, num_tt, t_tile)[:, :, :halo]
    x_halo = jnp.transpose(x_halo, (1, 0, 2))                         # (num_tt, b_pad, F-1)
    filters = _gaussian_filters(jnp.asarray(sigma, jnp.float32), filter_size, order)

    kernel = functools.partial(_dgf_kernel, n_ch=k, n_taps=filter_size, t_tile=t_tile)

    out = pl.pallas_call(
        kernel,
        grid=(num_bt, num_tt),
        out_shape=jax.ShapeDtypeStruct((b_pad, k, t_main), jnp.float32),
        in_specs=[
            pl.BlockSpec((b_tile, t_tile), lambda bi, ti: (bi, ti)),
            pl.BlockSpec((1, b_tile, halo), lambda bi, ti: (ti, bi, 0)),
            pl.BlockSpec((k, filter_size), lambda bi, ti: (0, 0),
                         memory_space=pltpu.MemorySpace.SMEM),
        ],
        out_specs=pl.BlockSpec((b_tile, k, t_tile), lambda bi, ti: (bi, 0, ti)),
        compiler_params=pltpu.CompilerParams(
            dimension_semantics=("parallel", "parallel"),
            vmem_limit_bytes=32 * 1024 * 1024,
        ),
    )(xext, x_halo, filters)

    return out[:b, :, :t]


def _reference(x, sigma, filter_size=11, order=2):
    """Pure-JAX reference mirroring the PyTorch forward (for validation)."""
    b, t = x.shape
    n = filter_size // 2
    xpad = jnp.pad(x.astype(jnp.float32), ((0, 0), (n, n)), mode="edge")
    filters = _gaussian_filters(jnp.asarray(sigma, jnp.float32), filter_size, order)
    outs = []
    for c in range(order + 1):
        acc = jnp.zeros((b, t), jnp.float32)
        for j in range(filter_size):
            acc = acc + filters[c, j] * xpad[:, j:j + t]
        outs.append(acc)
    return jnp.stack(outs, axis=1)


if __name__ == "__main__":
    filter_size = 11
    order = 2
    sigma = 1.0   # deterministic init of the learnable parameter (as in __init__)

    key = jax.random.PRNGKey(0)
    k1, k2 = jax.random.split(key)

    # Small shape matching the module's expected (batch_size, time_steps).
    B, T = 4, 128
    x = jax.random.normal(k1, (B, T), dtype=jnp.float32)
    y = jax.block_until_ready(deep_gaussian_filter(x, sigma, filter_size=filter_size, order=order))
    y_ref = _reference(x, sigma, filter_size, order)
    assert y.shape == (B, order + 1, T)
    assert jnp.allclose(y, y_ref, atol=1e-5, rtol=1e-5)

    # Second shape exercising multi-tile + cross-tile halo path.
    B2, T2 = 24, 700
    x2 = jax.random.normal(k2, (B2, T2), dtype=jnp.float32)
    y2 = jax.block_until_ready(deep_gaussian_filter(x2, sigma, filter_size=filter_size, order=order))
    y2_ref = _reference(x2, sigma, filter_size, order)
    assert y2.shape == (B2, order + 1, T2)
    assert jnp.allclose(y2, y2_ref, atol=1e-5, rtol=1e-5)

    print("KERNEL_OK")
</pallas_src>

<mosaic_0001>
module attributes {stable_mosaic.version = 11 : i64} {
  func.func @_dgf_kernel(%arg0: i32, %arg1: i32, %arg2: memref<8x128xf32, #tpu.memory_space<vmem>>, %arg3: memref<1x8x10xf32, #tpu.memory_space<vmem>>, %arg4: memref<3x11xf32, #tpu.memory_space<smem>>, %arg5: memref<8x3x128xf32, #tpu.memory_space<vmem>>) attributes {dimension_semantics = [#tpu.dimension_semantics<parallel>, #tpu.dimension_semantics<parallel>], iteration_bounds = array<i64: 1, 1>, scalar_prefetch = 0 : i64, scratch_operands = 0 : i64, tpu.core_type = #tpu.core_type<tc>, window_params = [{transform_indices = @transform_0, window_bounds = array<i64: 8, 128>}, {transform_indices = @transform_1, window_bounds = array<i64: 1, 8, 10>}, {transform_indices = @transform_2, window_bounds = array<i64: 3, 11>}, {transform_indices = @transform_3, window_bounds = array<i64: 8, 3, 128>}]} {
    %c0 = arith.constant 0 : index
    %c0_0 = arith.constant 0 : index
    %0 = vector.load %arg2[%c0, %c0_0] : memref<8x128xf32, #tpu.memory_space<vmem>>, vector<8x128xf32>
    %c0_1 = arith.constant 0 : index
    %c0_2 = arith.constant 0 : index
    %c0_3 = arith.constant 0 : index
    %1 = vector.load %arg3[%c0_1, %c0_2, %c0_3] : memref<1x8x10xf32, #tpu.memory_space<vmem>>, vector<1x8x10xf32>
    %2 = vector.shape_cast %1 : vector<1x8x10xf32> to vector<8x10xf32>
    %3 = tpu.concatenate %0, %2 in 1 : vector<8x128xf32>, vector<8x10xf32> -> vector<8x138xf32>
    %c0_4 = arith.constant 0 : index
    %c0_5 = arith.constant 0 : index
    %4 = memref.load %arg4[%c0_4, %c0_5] : memref<3x11xf32, #tpu.memory_space<smem>>
    %5 = vector.extract_strided_slice %3 {offsets = [0, 0], sizes = [8, 128], strides = [1, 1]} : vector<8x138xf32> to vector<8x128xf32>
    %6 = vector.broadcast %4 : f32 to vector<8x128xf32>
    %7 = arith.mulf %6, %5 : vector<8x128xf32>
    %c1 = arith.constant 1 : index
    %c0_6 = arith.constant 0 : index
    %8 = memref.load %arg4[%c1, %c0_6] : memref<3x11xf32, #tpu.memory_space<smem>>
    %9 = vector.extract_strided_slice %3 {offsets = [0, 0], sizes = [8, 128], strides = [1, 1]} : vector<8x138xf32> to vector<8x128xf32>
    %10 = vector.broadcast %8 : f32 to vector<8x128xf32>
    %11 = arith.mulf %10, %9 : vector<8x128xf32>
    %c2 = arith.constant 2 : index
    %c0_7 = arith.constant 0 : index
    %12 = memref.load %arg4[%c2, %c0_7] : memref<3x11xf32, #tpu.memory_space<smem>>
    %13 = vector.extract_strided_slice %3 {offsets = [0, 0], sizes = [8, 128], strides = [1, 1]} : vector<8x138xf32> to vector<8x128xf32>
    %14 = vector.broadcast %12 : f32 to vector<8x128xf32>
    %15 = arith.mulf %14, %13 : vector<8x128xf32>
    %16 = vector.extract_strided_slice %3 {offsets = [0, 1], sizes = [8, 128], strides = [1, 1]} : vector<8x138xf32> to vector<8x128xf32>
    %c0_8 = arith.constant 0 : index
    %c1_9 = arith.constant 1 : index
    %17 = memref.load %arg4[%c0_8, %c1_9] : memref<3x11xf32, #tpu.memory_space<smem>>
    %18 = vector.broadcast %17 : f32 to vector<8x128xf32>
    %19 = arith.mulf %18, %16 : vector<8x128xf32>
    %20 = arith.addf %7, %19 : vector<8x128xf32>
    %c1_10 = arith.constant 1 : index
    %c1_11 = arith.constant 1 : index
    %21 = memref.load %arg4[%c1_10, %c1_11] : memref<3x11xf32, #tpu.memory_space<smem>>
    %22 = vector.broadcast %21 : f32 to vector<8x128xf32>
    %23 = arith.mulf %22, %16 : vector<8x128xf32>
    %24 = arith.addf %11, %23 : vector<8x128xf32>
    %c2_12 = arith.constant 2 : index
    %c1_13 = arith.constant 1 : index
    %25 = memref.load %arg4[%c2_12, %c1_13] : memref<3x11xf32, #tpu.memory_space<smem>>
    %26 = vector.broadcast %25 : f32 to vector<8x128xf32>
    %27 = arith.mulf %26, %16 : vector<8x128xf32>
    %28 = arith.addf %15, %27 : vector<8x128xf32>
    %29 = vector.extract_strided_slice %3 {offsets = [0, 2], sizes = [8, 128], strides = [1, 1]} : vector<8x138xf32> to vector<8x128xf32>
    %c0_14 = arith.constant 0 : index
    %c2_15 = arith.constant 2 : index
    %30 = memref.load %arg4[%c0_14, %c2_15] : memref<3x11xf32, #tpu.memory_space<smem>>
    %31 = vector.broadcast %30 : f32 to vector<8x128xf32>
    %32 = arith.mulf %31, %29 : vector<8x128xf32>
    %33 = arith.addf %20, %32 : vector<8x128xf32>
    %c1_16 = arith.constant 1 : index
    %c2_17 = arith.constant 2 : index
    %34 = memref.load %arg4[%c1_16, %c2_17] : memref<3x11xf32, #tpu.memory_space<smem>>
    %35 = vector.broadcast %34 : f32 to vector<8x128xf32>
    %36 = arith.mulf %35, %29 : vector<8x128xf32>
    %37 = arith.addf %24, %36 : vector<8x128xf32>
    %c2_18 = arith.constant 2 : index
    %c2_19 = arith.constant 2 : index
    %38 = memref.load %arg4[%c2_18, %c2_19] : memref<3x11xf32, #tpu.memory_space<smem>>
    %39 = vector.broadcast %38 : f32 to vector<8x128xf32>
    %40 = arith.mulf %39, %29 : vector<8x128xf32>
    %41 = arith.addf %28, %40 : vector<8x128xf32>
    %42 = vector.extract_strided_slice %3 {offsets = [0, 3], sizes = [8, 128], strides = [1, 1]} : vector<8x138xf32> to vector<8x128xf32>
    %c0_20 = arith.constant 0 : index
    %c3 = arith.constant 3 : index
    %43 = memref.load %arg4[%c0_20, %c3] : memref<3x11xf32, #tpu.memory_space<smem>>
    %44 = vector.broadcast %43 : f32 to vector<8x128xf32>
    %45 = arith.mulf %44, %42 : vector<8x128xf32>
    %46 = arith.addf %33, %45 : vector<8x128xf32>
    %c1_21 = arith.constant 1 : index
    %c3_22 = arith.constant 3 : index
    %47 = memref.load %arg4[%c1_21, %c3_22] : memref<3x11xf32, #tpu.memory_space<smem>>
    %48 = vector.broadcast %47 : f32 to vector<8x128xf32>
    %49 = arith.mulf %48, %42 : vector<8x128xf32>
    %50 = arith.addf %37, %49 : vector<8x128xf32>
    %c2_23 = arith.constant 2 : index
    %c3_24 = arith.constant 3 : index
    %51 = memref.load %arg4[%c2_23, %c3_24] : memref<3x11xf32, #tpu.memory_space<smem>>
    %52 = vector.broadcast %51 : f32 to vector<8x128xf32>
    %53 = arith.mulf %52, %42 : vector<8x128xf32>
    %54 = arith.addf %41, %53 : vector<8x128xf32>
    %55 = vector.extract_strided_slice %3 {offsets = [0, 4], sizes = [8, 128], strides = [1, 1]} : vector<8x138xf32> to vector<8x128xf32>
    %c0_25 = arith.constant 0 : index
    %c4 = arith.constant 4 : index
    %56 = memref.load %arg4[%c0_25, %c4] : memref<3x11xf32, #tpu.memory_space<smem>>
    %57 = vector.broadcast %56 : f32 to vector<8x128xf32>
    %58 = arith.mulf %57, %55 : vector<8x128xf32>
    %59 = arith.addf %46, %58 : vector<8x128xf32>
    %c1_26 = arith.constant 1 : index
    %c4_27 = arith.constant 4 : index
    %60 = memref.load %arg4[%c1_26, %c4_27] : memref<3x11xf32, #tpu.memory_space<smem>>
    %61 = vector.broadcast %60 : f32 to vector<8x128xf32>
    %62 = arith.mulf %61, %55 : vector<8x128xf32>
    %63 = arith.addf %50, %62 : vector<8x128xf32>
    %c2_28 = arith.constant 2 : index
    %c4_29 = arith.constant 4 : index
    %64 = memref.load %arg4[%c2_28, %c4_29] : memref<3x11xf32, #tpu.memory_space<smem>>
    %65 = vector.broadcast %64 : f32 to vector<8x128xf32>
    %66 = arith.mulf %65, %55 : vector<8x128xf32>
    %67 = arith.addf %54, %66 : vector<8x128xf32>
    %68 = vector.extract_strided_slice %3 {offsets = [0, 5], sizes = [8, 128], strides = [1, 1]} : vector<8x138xf32> to vector<8x128xf32>
    %c0_30 = arith.constant 0 : index
    %c5 = arith.constant 5 : index
    %69 = memref.load %arg4[%c0_30, %c5] : memref<3x11xf32, #tpu.memory_space<smem>>
    %70 = vector.broadcast %69 : f32 to vector<8x128xf32>
    %71 = arith.mulf %70, %68 : vector<8x128xf32>
    %72 = arith.addf %59, %71 : vector<8x128xf32>
    %c1_31 = arith.constant 1 : index
    %c5_32 = arith.constant 5 : index
    %73 = memref.load %arg4[%c1_31, %c5_32] : memref<3x11xf32, #tpu.memory_space<smem>>
    %74 = vector.broadcast %73 : f32 to vector<8x128xf32>
    %75 = arith.mulf %74, %68 : vector<8x128xf32>
    %76 = arith.addf %63, %75 : vector<8x128xf32>
    %c2_33 = arith.constant 2 : index
    %c5_34 = arith.constant 5 : index
    %77 = memref.load %arg4[%c2_33, %c5_34] : memref<3x11xf32, #tpu.memory_space<smem>>
    %78 = vector.broadcast %77 : f32 to vector<8x128xf32>
    %79 = arith.mulf %78, %68 : vector<8x128xf32>
    %80 = arith.addf %67, %79 : vector<8x128xf32>
    %81 = vector.extract_strided_slice %3 {offsets = [0, 6], sizes = [8, 128], strides = [1, 1]} : vector<8x138xf32> to vector<8x128xf32>
    %c0_35 = arith.constant 0 : index
    %c6 = arith.constant 6 : index
    %82 = memref.load %arg4[%c0_35, %c6] : memref<3x11xf32, #tpu.memory_space<smem>>
    %83 = vector.broadcast %82 : f32 to vector<8x128xf32>
    %84 = arith.mulf %83, %81 : vector<8x128xf32>
    %85 = arith.addf %72, %84 : vector<8x128xf32>
    %c1_36 = arith.constant 1 : index
    %c6_37 = arith.constant 6 : index
    %86 = memref.load %arg4[%c1_36, %c6_37] : memref<3x11xf32, #tpu.memory_space<smem>>
    %87 = vector.broadcast %86 : f32 to vector<8x128xf32>
    %88 = arith.mulf %87, %81 : vector<8x128xf32>
    %89 = arith.addf %76, %88 : vector<8x128xf32>
    %c2_38 = arith.constant 2 : index
    %c6_39 = arith.constant 6 : index
    %90 = memref.load %arg4[%c2_38, %c6_39] : memref<3x11xf32, #tpu.memory_space<smem>>
    %91 = vector.broadcast %90 : f32 to vector<8x128xf32>
    %92 = arith.mulf %91, %81 : vector<8x128xf32>
    %93 = arith.addf %80, %92 : vector<8x128xf32>
    %94 = vector.extract_strided_slice %3 {offsets = [0, 7], sizes = [8, 128], strides = [1, 1]} : vector<8x138xf32> to vector<8x128xf32>
    %c0_40 = arith.constant 0 : index
    %c7 = arith.constant 7 : index
    %95 = memref.load %arg4[%c0_40, %c7] : memref<3x11xf32, #tpu.memory_space<smem>>
    %96 = vector.broadcast %95 : f32 to vector<8x128xf32>
    %97 = arith.mulf %96, %94 : vector<8x128xf32>
    %98 = arith.addf %85, %97 : vector<8x128xf32>
    %c1_41 = arith.constant 1 : index
    %c7_42 = arith.constant 7 : index
    %99 = memref.load %arg4[%c1_41, %c7_42] : memref<3x11xf32, #tpu.memory_space<smem>>
    %100 = vector.broadcast %99 : f32 to vector<8x128xf32>
    %101 = arith.mulf %100, %94 : vector<8x128xf32>
    %102 = arith.addf %89, %101 : vector<8x128xf32>
    %c2_43 = arith.constant 2 : index
    %c7_44 = arith.constant 7 : index
    %103 = memref.load %arg4[%c2_43, %c7_44] : memref<3x11xf32, #tpu.memory_space<smem>>
    %104 = vector.broadcast %103 : f32 to vector<8x128xf32>
    %105 = arith.mulf %104, %94 : vector<8x128xf32>
    %106 = arith.addf %93, %105 : vector<8x128xf32>
    %107 = vector.extract_strided_slice %3 {offsets = [0, 8], sizes = [8, 128], strides = [1, 1]} : vector<8x138xf32> to vector<8x128xf32>
    %c0_45 = arith.constant 0 : index
    %c8 = arith.constant 8 : index
    %108 = memref.load %arg4[%c0_45, %c8] : memref<3x11xf32, #tpu.memory_space<smem>>
    %109 = vector.broadcast %108 : f32 to vector<8x128xf32>
    %110 = arith.mulf %109, %107 : vector<8x128xf32>
    %111 = arith.addf %98, %110 : vector<8x128xf32>
    %c1_46 = arith.constant 1 : index
    %c8_47 = arith.constant 8 : index
    %112 = memref.load %arg4[%c1_46, %c8_47] : memref<3x11xf32, #tpu.memory_space<smem>>
    %113 = vector.broadcast %112 : f32 to vector<8x128xf32>
    %114 = arith.mulf %113, %107 : vector<8x128xf32>
    %115 = arith.addf %102, %114 : vector<8x128xf32>
    %c2_48 = arith.constant 2 : index
    %c8_49 = arith.constant 8 : index
    %116 = memref.load %arg4[%c2_48, %c8_49] : memref<3x11xf32, #tpu.memory_space<smem>>
    %117 = vector.broadcast %116 : f32 to vector<8x128xf32>
    %118 = arith.mulf %117, %107 : vector<8x128xf32>
    %119 = arith.addf %106, %118 : vector<8x128xf32>
    %120 = vector.extract_strided_slice %3 {offsets = [0, 9], sizes = [8, 128], strides = [1, 1]} : vector<8x138xf32> to vector<8x128xf32>
    %c0_50 = arith.constant 0 : index
    %c9 = arith.constant 9 : index
    %121 = memref.load %arg4[%c0_50, %c9] : memref<3x11xf32, #tpu.memory_space<smem>>
    %122 = vector.broadcast %121 : f32 to vector<8x128xf32>
    %123 = arith.mulf %122, %120 : vector<8x128xf32>
    %124 = arith.addf %111, %123 : vector<8x128xf32>
    %c1_51 = arith.constant 1 : index
    %c9_52 = arith.constant 9 : index
    %125 = memref.load %arg4[%c1_51, %c9_52] : memref<3x11xf32, #tpu.memory_space<smem>>
    %126 = vector.broadcast %125 : f32 to vector<8x128xf32>
    %127 = arith.mulf %126, %120 : vector<8x128xf32>
    %128 = arith.addf %115, %127 : vector<8x128xf32>
    %c2_53 = arith.constant 2 : index
    %c9_54 = arith.constant 9 : index
    %129 = memref.load %arg4[%c2_53, %c9_54] : memref<3x11xf32, #tpu.memory_space<smem>>
    %130 = vector.broadcast %129 : f32 to vector<8x128xf32>
    %131 = arith.mulf %130, %120 : vector<8x128xf32>
    %132 = arith.addf %119, %131 : vector<8x128xf32>
    %133 = vector.extract_strided_slice %3 {offsets = [0, 10], sizes = [8, 128], strides = [1, 1]} : vector<8x138xf32> to vector<8x128xf32>
    %c0_55 = arith.constant 0 : index
    %c10 = arith.constant 10 : index
    %134 = memref.load %arg4[%c0_55, %c10] : memref<3x11xf32, #tpu.memory_space<smem>>
    %135 = vector.broadcast %134 : f32 to vector<8x128xf32>
    %136 = arith.mulf %135, %133 : vector<8x128xf32>
    %137 = arith.addf %124, %136 : vector<8x128xf32>
    %c1_56 = arith.constant 1 : index
    %c10_57 = arith.constant 10 : index
    %138 = memref.load %arg4[%c1_56, %c10_57] : memref<3x11xf32, #tpu.memory_space<smem>>
    %139 = vector.broadcast %138 : f32 to vector<8x128xf32>
    %140 = arith.mulf %139, %133 : vector<8x128xf32>
    %141 = arith.addf %128, %140 : vector<8x128xf32>
    %c2_58 = arith.constant 2 : index
    %c10_59 = arith.constant 10 : index
    %142 = memref.load %arg4[%c2_58, %c10_59] : memref<3x11xf32, #tpu.memory_space<smem>>
    %143 = vector.broadcast %142 : f32 to vector<8x128xf32>
    %144 = arith.mulf %143, %133 : vector<8x128xf32>
    %145 = arith.addf %132, %144 : vector<8x128xf32>
    %c0_60 = arith.constant 0 : index
    %c0_61 = arith.constant 0 : index
    %c0_62 = arith.constant 0 : index
    %146 = vector.load %arg5[%c0_60, %c0_61, %c0_62] : memref<8x3x128xf32, #tpu.memory_space<vmem>>, vector<8x1x128xf32>
    %147 = vector.shape_cast %146 : vector<8x1x128xf32> to vector<8x128xf32>
    %148 = vector.shape_cast %137 : vector<8x128xf32> to vector<8x1x128xf32>
    tpu.vector_store %arg5[%c0_60, %c0_61, %c0_62], %148 {strides = array<i32>} : memref<8x3x128xf32, #tpu.memory_space<vmem>>, vector<8x1x128xf32>,
    %c0_63 = arith.constant 0 : index
    %c1_64 = arith.constant 1 : index
    %c0_65 = arith.constant 0 : index
    %149 = vector.load %arg5[%c0_63, %c1_64, %c0_65] : memref<8x3x128xf32, #tpu.memory_space<vmem>>, vector<8x1x128xf32>
    %150 = vector.shape_cast %149 : vector<8x1x128xf32> to vector<8x128xf32>
    %151 = vector.shape_cast %141 : vector<8x128xf32> to vector<8x1x128xf32>
    tpu.vector_store %arg5[%c0_63, %c1_64, %c0_65], %151 {strides = array<i32>} : memref<8x3x128xf32, #tpu.memory_space<vmem>>, vector<8x1x128xf32>,
    %c0_66 = arith.constant 0 : index
    %c2_67 = arith.constant 2 : index
    %c0_68 = arith.constant 0 : index
    %152 = vector.load %arg5[%c0_66, %c2_67, %c0_68] : memref<8x3x128xf32, #tpu.memory_space<vmem>>, vector<8x1x128xf32>
    %153 = vector.shape_cast %152 : vector<8x1x128xf32> to vector<8x128xf32>
    %154 = vector.shape_cast %145 : vector<8x128xf32> to vector<8x1x128xf32>
    tpu.vector_store %arg5[%c0_66, %c2_67, %c0_68], %154 {strides = array<i32>} : memref<8x3x128xf32, #tpu.memory_space<vmem>>, vector<8x1x128xf32>,
    return
  }
  func.func @transform_0(%arg0: i32, %arg1: i32) -> (i32, i32) {
    %c0_i32 = arith.constant 0 : i32
    return %arg0, %arg1 : i32, i32
  }
  func.func @transform_1(%arg0: i32, %arg1: i32) -> (i32, i32, i32) {
    %c0_i32 = arith.constant 0 : i32
    %c0_i32_0 = arith.constant 0 : i32
    return %arg1, %arg0, %c0_i32 : i32, i32, i32
  }
  func.func @transform_2(%arg0: i32, %arg1: i32) -> (i32, i32) {
    %c0_i32 = arith.constant 0 : i32
    %c0_i32_0 = arith.constant 0 : i32
    %c0_i32_1 = arith.constant 0 : i32
    return %c0_i32, %c0_i32_0 : i32, i32
  }
  func.func @transform_3(%arg0: i32, %arg1: i32) -> (i32, i32, i32) {
    %c0_i32 = arith.constant 0 : i32
    %c0_i32_0 = arith.constant 0 : i32
    return %arg0, %c0_i32, %arg1 : i32, i32, i32
  }
}

</mosaic_0001>

<bundles_post_ra>
// kernel: tpu_custom_call.1
= control target key start
LH: loop header
LB: loop body
LE: loop exit
PB: predicated region body
PF: predicated region fallthrough
CT: control target
= control target key end

     0   :  { %8 = vsyncpa [#allocation3], 0  ;;  %s1041_s0 = inlined_call_operand.hbm [shape: f32[8,256], index: 0, kind: input, shape index: {}]   ;;  %s1042_s1 = inlined_call_operand.hbm [shape: f32[1,8,10], index: 1, kind: input, shape index: {}]   ;;  %s1043_s2 = inlined_call_operand.vmem [shape: f32[3,11], index: 2, kind: input, shape index: {}]   ;;  %s1044_s3 = inlined_call_operand.vmem [shape: f32[8,3,128], index: 3, kind: output, shape index: {}]  }
   0x1   :  { %9 = vsyncpa [#allocation6], 0 }
   0x2   :  { %10 = vsyncpa [#allocation4], 0  ;;  %s787_s12 = smov [#allocation2]   ;;  %s788_s14 = smov [#allocation5]  }
   0x3   :  { %s17_s13 = sshll.u32 %s787_s12, 4  ;;  %s27_s15 = sshll.u32 %s788_s14, 4  ;;  %s18_s13 = int_to_ptr.vmem [resolvable:$true] %s17_s13  ;;  %s821_s15 = int_to_ptr.vmem [resolvable:$true] %s27_s15 }
   0x4   :  { %s725_s18 = scalar_lea.hbm %s1041_s0, 128  ;;  %s727_s23 = scalar_lea.hbm %s1041_s0, 256 }
   0x5   :  { %p726_p0 = scmp.ne.s32.totalorder %s1041_s0, %s725_s18  ;;  %p728_p1 = scmp.lt.u32.totalorder %s727_s23, %s725_s18 }
   0x6   :  { %p729_p2 = scmp.lt.u32.totalorder %s725_s18, %s1041_s0 }
   0x8   :  { %p730_p3 = por %p729_p2, %p728_p1 }
   0xa   :  { %p731_p4 = pnand %p730_p3, %p726_p0 }
   0xc   :  { %734 = shalt.err (!%p731_p4)
}
   0xd   :  { %s735_s26 = scalar_lea.vmem %s18_s13, 128  ;;  %p740_p6 = scmp.lt.s32.totalorder %s18_s13, %s18_s13 }
   0xe   :  { %p736_p5 = scmp.ne.s32.totalorder %s18_s13, %s735_s26  ;;  %p741_p7 = scmp.lt.s32.totalorder %s735_s26, %s735_s26 }
  0x10   :  { %p742_p8 = por %p741_p7, %p740_p6 }
  0x12   :  { %p743_p9 = pnand %p742_p8, %p736_p5 }
  0x14   :  { %746 = shalt.err (!%p743_p9)
}
  0x15   :  { %20 = dma.hbm_to_vmem [thread:$0]  %s1041_s0, 128, %s18_s13, [#allocation3]  }
  0x16   :  { %s747_s4 = scalar_lea.hbm %s1042_s1, 128 }
  0x17   :  { %p748_p10 = scmp.ne.s32.totalorder %s1042_s1, %s747_s4  ;;  %p751_p11 = scmp.lt.u32.totalorder %s747_s4, %s1042_s1 }
  0x19   :  { %p753_p12 = pnand %p751_p11, %p748_p10 }
  0x1b   :  { %756 = shalt.err (!%p753_p12)
}
  0x1c   :  { %s757_s9 = scalar_lea.vmem %s821_s15, 128  ;;  %p762_p0 = scmp.lt.s32.totalorder %s821_s15, %s821_s15 }
  0x1d   :  { %p758_p13 = scmp.ne.s32.totalorder %s821_s15, %s757_s9  ;;  %p763_p1 = scmp.lt.s32.totalorder %s757_s9, %s757_s9 }
  0x1f   :  { %p764_p2 = por %p763_p1, %p762_p0 }
  0x21   :  { %p765_p3 = pnand %p764_p2, %p758_p13 }
  0x23   :  { %768 = shalt.err (!%p765_p3)
}
  0x24   :  { %30 = dma.hbm_to_vmem [thread:$0]  %s1042_s1, 128, %s821_s15, [#allocation6]  }
  0x25   :  { %s37_s13 = sshll.u32 %s1043_s2, 4  ;;  %s38_s13 = int_to_ptr.vmem [resolvable:$true] %s37_s13 }
  0x26   :  { %s769_s14 = scalar_lea.vmem %s38_s13, 64  ;;  %p774_p5 = scmp.lt.s32.totalorder %s38_s13, %s38_s13 }
  0x27   :  { %p770_p4 = scmp.ne.s32.totalorder %s38_s13, %s769_s14  ;;  %p775_p6 = scmp.lt.s32.totalorder %s769_s14, %s769_s14 }
  0x29   :  { %p776_p7 = por %p775_p6, %p774_p5 }
  0x2b   :  { %p777_p8 = pnand %p776_p7, %p770_p4 }
  0x2d   :  { %780 = shalt.err (!%p777_p8)
}
  0x2e   :  { %s789_s16 = smov [#allocation7]  }
  0x2f   :  { %40 = dma.vmem_to_smem %s38_s13, 64, %s789_s16, [#allocation4]  }
  0x30   :  { %781 = dma.done.wait [#allocation3], 128  }
  0x31   :  { %782 = vsyncadd [#allocation3], 4294967168 }
  0x32   :  { %783 = dma.done.wait [#allocation6], 128  }
  0x33   :  { %784 = vsyncadd [#allocation6], 4294967168 }
  0x34   :  { %785 = dma.done.wait [#allocation4], 64  }
  0x35   :  { %786 = vsyncadd [#allocation4], 4294967232 }
  0x36   :  { %50 = sfence }
  0x37   :  { %s670_s1 = sld [smem:[#allocation7 + $0x81]]  ;;  %v858_v0 = vld [vmem:[#allocation2] sm:$0xff]  ;;  %v860_v1 = vld [vmem:[#allocation5] sm:$0xff]  ;;  %s672_s17 = sld [smem:[#allocation7 + $0x2]]  ;;  %vm72_vm0 = vcmask 1039360   ;;  %vm112_vm1 = vcmask 1031168  }
  0x38   :  { %s669_s15 = sld [smem:[#allocation7 + $0x1]]  ;;  %s790_s18 = smov 127   ;;  %vm152_vm2 = vcmask 1022976   ;;  %vm192_vm3 = vcmask 1014784   ;;  %vm232_vm4 = vcmask 1006592   ;;  %vm272_vm5 = vcmask 998400  }
  0x39   :  { %s671_s2 = sld [smem:[#allocation7 + $0x101]]  ;;  %s673_s19 = sld [smem:[#allocation7 + $0x82]]  ;;  %vm312_vm6 = vcmask 990208   ;;  %vm352_vm7 = vcmask 982016   ;;  %vm392_vm8 = vcmask 973824   ;;  %vm432_vm9 = vcmask 965632  }
  0x3a   :  { %s674_s20 = sld [smem:[#allocation7 + $0x102]]  ;;  %s675_s21 = sld [smem:[#allocation7 + $0x3]] }
  0x3b   :  { %s791_s22 = smov 126   ;;  %s676_s23 = sld [smem:[#allocation7 + $0x83]] }
  0x3c   :  { %s677_s24 = sld [smem:[#allocation7 + $0x103]]  ;;  %s678_s25 = sld [smem:[#allocation7 + $0x4]] }
  0x3d   :  { %v77_v2 = vstv %s670_s1  ;;  %v103_v11 = vstv %s672_s17  ;;  %s792_s26 = smov 125   ;;  %s679_s27 = sld [smem:[#allocation7 + $0x84]] }
  0x3e   :  { %v78_v3 = vmul.f32 %v77_v2, %v858_v0  ;;  %v63_v4 = vstv %s669_s15  ;;  %v79_v6 = vmul.f32 %v77_v2, %v860_v1  ;;  %v105_v12 = vmul.f32 %v103_v11, %v860_v1  ;;  %s680_s28 = sld [smem:[#allocation7 + $0x104]]  ;;  %s681_s29 = sld [smem:[#allocation7 + $0x5]] }
  0x3f   :  { %v64_v5 = vmul.f32 %v63_v4, %v858_v0  ;;  %v65_v7 = vmul.f32 %v63_v4, %v860_v1  ;;  %v90_v8 = vstv %s671_s2  ;;  %v104_v13 = vmul.f32 %v103_v11, %v858_v0  ;;  %s793_s30 = smov 124   ;;  %s682_s4 = sld [smem:[#allocation7 + $0x85]] }
  0x40   :  { %82 = vrot.lane.b32.xlu1 %v78_v3, %s790_s18  ;;  %v92_v9 = vmul.f32 %v90_v8, %v860_v1  ;;  %v91_v10 = vmul.f32 %v90_v8, %v858_v0  ;;  %v117_v14 = vstv %s673_s19  ;;  %v130_v17 = vstv %s674_s20  ;;  %s683_s5 = sld [smem:[#allocation7 + $0x105]]  ;;  %s684_s6 = sld [smem:[#allocation7 + $0x6]] }
  0x41   :  { %68 = vrot.lane.b32.xlu0 %v64_v5, %s790_s18  ;;  %v119_v15 = vmul.f32 %v117_v14, %v860_v1  ;;  %v118_v16 = vmul.f32 %v117_v14, %v858_v0  ;;  %v132_v18 = vmul.f32 %v130_v17, %v860_v1  ;;  %v131_v19 = vmul.f32 %v130_v17, %v858_v0  ;;  %s794_s7 = smov 123   ;;  %s685_s8 = sld [smem:[#allocation7 + $0x86]] }
  0x42   :  { %v143_v20 = vstv %s675_s21  ;;  %v157_v23 = vstv %s676_s23  ;;  %v170_v26 = vstv %s677_s24  ;;  %v183_v29 = vstv %s678_s25  ;;  %s686_s9 = sld [smem:[#allocation7 + $0x106]]  ;;  %s687_s0 = sld [smem:[#allocation7 + $0x7]] }
  0x43   :  { %v145_v21 = vmul.f32 %v143_v20, %v860_v1  ;;  %v144_v22 = vmul.f32 %v143_v20, %v858_v0  ;;  %v159_v24 = vmul.f32 %v157_v23, %v860_v1  ;;  %v158_v25 = vmul.f32 %v157_v23, %v858_v0  ;;  %s795_s10 = smov 122   ;;  %s688_s11 = sld [smem:[#allocation7 + $0x87]] }
  0x44   :  { %84 = vrot.lane.b32.xlu1 %v79_v6, %s790_s18  ;;  %v172_v27 = vmul.f32 %v170_v26, %v860_v1  ;;  %v171_v28 = vmul.f32 %v170_v26, %v858_v0  ;;  %v185_v30 = vmul.f32 %v183_v29, %v860_v1  ;;  %v184_v31 = vmul.f32 %v183_v29, %v858_v0  ;;  %s689_s12 = sld [smem:[#allocation7 + $0x107]]  ;;  %s690_s13 = sld [smem:[#allocation7 + $0x8]] }
  0x45   :  { %70 = vrot.lane.b32.xlu0 %v65_v7, %s790_s18  ;;  %v197_v32 = vstv %s679_s27  ;;  %v210_v35 = vstv %s680_s28  ;;  %v223_v38 = vstv %s681_s29  ;;  %s796_s14 = smov 121   ;;  %s691_s16 = sld [smem:[#allocation7 + $0x88]] }
  0x46   :  { %v199_v33 = vmul.f32 %v197_v32, %v860_v1  ;;  %v198_v34 = vmul.f32 %v197_v32, %v858_v0  ;;  %v212_v36 = vmul.f32 %v210_v35, %v860_v1  ;;  %v211_v37 = vmul.f32 %v210_v35, %v858_v0  ;;  %s692_s1 = sld [smem:[#allocation7 + $0x108]]  ;;  %s693_s15 = sld [smem:[#allocation7 + $0x9]] }
  0x47   :  { %v225_v39 = vmul.f32 %v223_v38, %v860_v1  ;;  %v224_v40 = vmul.f32 %v223_v38, %v858_v0  ;;  %v237_v41 = vstv %s682_s4  ;;  %v250_v44 = vstv %s683_s5  ;;  %s797_s2 = smov 120   ;;  %s694_s17 = sld [smem:[#allocation7 + $0x89]] }
  0x48   :  { %97 = vrot.lane.b32.xlu1 %v92_v9, %s790_s18  ;;  %v239_v42 = vmul.f32 %v237_v41, %v860_v1  ;;  %v238_v43 = vmul.f32 %v237_v41, %v858_v0  ;;  %v252_v45 = vmul.f32 %v250_v44, %v860_v1  ;;  %v251_v46 = vmul.f32 %v250_v44, %v858_v0  ;;  %s696_s19 = sld [smem:[#allocation7 + $0xa]]  ;;  %s798_s20 = smov 119  }
  0x49   :  { %95 = vrot.lane.b32.xlu0 %v91_v10, %s790_s18  ;;  %v263_v47 = vstv %s684_s6  ;;  %v277_v50 = vstv %s685_s8  ;;  %v290_v53 = vstv %s686_s9  ;;  %s695_s18 = sld [smem:[#allocation7 + $0x109]]  ;;  %s697_s21 = sld [smem:[#allocation7 + $0x8a]] }
  0x4a   :  { %v265_v48 = vmul.f32 %v263_v47, %v860_v1  ;;  %v264_v49 = vmul.f32 %v263_v47, %v858_v0  ;;  %v279_v51 = vmul.f32 %v277_v50, %v860_v1  ;;  %v278_v52 = vmul.f32 %v277_v50, %v858_v0  ;;  %s667_s23 = sld [smem:[#allocation7 + $0x80]]  ;;  %s799_s25 = smov 118  }
  0x4b   :  { %v292_v54 = vmul.f32 %v290_v53, %v860_v1  ;;  %v291_v55 = vmul.f32 %v290_v53, %v858_v0  ;;  %v303_v56 = vstv %s687_s0  ;;  %v317_v59 = vstv %s688_s11  ;;  %s53_s24 = sld [smem:[#allocation7]] }
  0x4c   :  { %110 = vrot.lane.b32.xlu1 %v105_v12, %s791_s22  ;;  %v305_v57 = vmul.f32 %v303_v56, %v860_v1  ;;  %v304_v58 = vmul.f32 %v303_v56, %v858_v0  ;;  %v319_v60 = vmul.f32 %v317_v59, %v860_v1  ;;  %v318_v61 = vmul.f32 %v317_v59, %v858_v0 }
  0x4d   :  { %108 = vrot.lane.b32.xlu0 %v104_v13, %s791_s22  ;;  %v330_v62 = vstv %s689_s12  ;;  %v343_v3 = vstv %s690_s13  ;;  %v357_v6 = vstv %s691_s16 }
  0x4e   :  { %v332_v63 = vmul.f32 %v330_v62, %v860_v1  ;;  %v331_v2 = vmul.f32 %v330_v62, %v858_v0  ;;  %v345_v4 = vmul.f32 %v343_v3, %v860_v1  ;;  %v344_v5 = vmul.f32 %v343_v3, %v858_v0 }
  0x4f   :  { %v359_v7 = vmul.f32 %v357_v6, %v860_v1  ;;  %v358_v8 = vmul.f32 %v357_v6, %v858_v0  ;;  %v370_v9 = vstv %s692_s1  ;;  %v383_v12 = vstv %s693_s15 }
  0x50   :  { %124 = vrot.lane.b32.xlu1 %v119_v15, %s791_s22  ;;  %v372_v10 = vmul.f32 %v370_v9, %v860_v1  ;;  %v371_v11 = vmul.f32 %v370_v9, %v858_v0  ;;  %v385_v13 = vmul.f32 %v383_v12, %v860_v1  ;;  %v384_v14 = vmul.f32 %v383_v12, %v858_v0 }
  0x51   :  { %122 = vrot.lane.b32.xlu0 %v118_v16, %s791_s22  ;;  %v397_v15 = vstv %s694_s17  ;;  %v54_v32 = vstv %s53_s24 }
  0x52   :  { %v399_v16 = vmul.f32 %v397_v15, %v860_v1  ;;  %v398_v17 = vmul.f32 %v397_v15, %v858_v0  ;;  %v55_v35 = vmul.f32 %v54_v32, %v858_v0 }
  0x54   :  { %137 = vrot.lane.b32.xlu1 %v132_v18, %s791_s22  ;;  %v410_v18 = vstv %s695_s18 }
  0x55   :  { %135 = vrot.lane.b32.xlu0 %v131_v19, %s791_s22  ;;  %v412_v19 = vmul.f32 %v410_v18, %v860_v1  ;;  %v411_v20 = vmul.f32 %v410_v18, %v858_v0  ;;  %s698_s22 = sld [smem:[#allocation7 + $0x10a]] }
  0x58   :  { %150 = vrot.lane.b32.xlu1 %v145_v21, %s792_s26  ;;  %v423_v21 = vstv %s696_s19 }
  0x59   :  { %148 = vrot.lane.b32.xlu0 %v144_v22, %s792_s26  ;;  %v425_v22 = vmul.f32 %v423_v21, %v860_v1  ;;  %v424_v23 = vmul.f32 %v423_v21, %v858_v0 }
  0x5c   :  { %164 = vrot.lane.b32.xlu1 %v159_v24, %s792_s26  ;;  %v437_v24 = vstv %s697_s21 }
  0x5d   :  { %162 = vrot.lane.b32.xlu0 %v158_v25, %s792_s26  ;;  %v439_v25 = vmul.f32 %v437_v24, %v860_v1  ;;  %v438_v26 = vmul.f32 %v437_v24, %v858_v0 }
  0x60   :  { %177 = vrot.lane.b32.xlu1 %v172_v27, %s792_s26  ;;  %v450_v27 = vstv %s698_s22 }
  0x61   :  { %175 = vrot.lane.b32.xlu0 %v171_v28, %s792_s26  ;;  %s668_s26 = sld [smem:[#allocation7 + $0x100]]  ;;  %v452_v28 = vmul.f32 %v450_v27, %v860_v1  ;;  %v451_v29 = vmul.f32 %v450_v27, %v858_v0 }
  0x64   :  { %190 = vrot.lane.b32.xlu1 %v185_v30, %s793_s30  ;;  %v57_v30 = vstv %s667_s23 }
  0x65   :  { %188 = vrot.lane.b32.xlu0 %v184_v31, %s793_s30 }
  0x68   :  { %204 = vrot.lane.b32.xlu1 %v199_v33, %s793_s30 }
  0x69   :  { %202 = vrot.lane.b32.xlu0 %v198_v34, %s793_s30  ;;  %v58_v34 = vmul.f32 %v57_v30, %v858_v0 }
  0x6c   :  { %217 = vrot.lane.b32.xlu1 %v212_v36, %s793_s30 }
  0x6d   :  { %215 = vrot.lane.b32.xlu0 %v211_v37, %s793_s30  ;;  %v60_v37 = vstv %s668_s26 }
  0x70   :  { %230 = vrot.lane.b32.xlu1 %v225_v39, %s794_s7 }
  0x71   :  { %228 = vrot.lane.b32.xlu0 %v224_v40, %s794_s7 }
  0x74   :  { %244 = vrot.lane.b32.xlu1 %v239_v42, %s794_s7  ;;  %v61_v42 = vmul.f32 %v60_v37, %v858_v0 }
  0x75   :  { %242 = vrot.lane.b32.xlu0 %v238_v43, %s794_s7 }
  0x78   :  { %257 = vrot.lane.b32.xlu1 %v252_v45, %s794_s7 }
  0x79   :  { %255 = vrot.lane.b32.xlu0 %v251_v46, %s794_s7 }
  0x7c   :  { %270 = vrot.lane.b32.xlu1 %v265_v48, %s795_s10 }
  0x7d   :  { %268 = vrot.lane.b32.xlu0 %v264_v49, %s795_s10 }
  0x80   :  { %284 = vrot.lane.b32.xlu1 %v279_v51, %s795_s10 }
  0x81   :  { %282 = vrot.lane.b32.xlu0 %v278_v52, %s795_s10 }
  0x84   :  { %297 = vrot.lane.b32.xlu1 %v292_v54, %s795_s10 }
  0x85   :  { %295 = vrot.lane.b32.xlu0 %v291_v55, %s795_s10 }
  0x88   :  { %310 = vrot.lane.b32.xlu1 %v305_v57, %s796_s14 }
  0x89   :  { %308 = vrot.lane.b32.xlu0 %v304_v58, %s796_s14 }
  0x8c   :  { %324 = vrot.lane.b32.xlu1 %v319_v60, %s796_s14 }
  0x8d   :  { %322 = vrot.lane.b32.xlu0 %v318_v61, %s796_s14 }
  0x90   :  { %337 = vrot.lane.b32.xlu1 %v332_v63, %s796_s14 }
  0x91   :  { %335 = vrot.lane.b32.xlu0 %v331_v2, %s796_s14 }
  0x94   :  { %350 = vrot.lane.b32.xlu1 %v345_v4, %s797_s2 }
  0x95   :  { %348 = vrot.lane.b32.xlu0 %v344_v5, %s797_s2 }
  0x98   :  { %364 = vrot.lane.b32.xlu1 %v359_v7, %s797_s2 }
  0x99   :  { %362 = vrot.lane.b32.xlu0 %v358_v8, %s797_s2 }
  0x9c   :  { %377 = vrot.lane.b32.xlu1 %v372_v10, %s797_s2 }
  0x9d   :  { %375 = vrot.lane.b32.xlu0 %v371_v11, %s797_s2 }
  0xa0   :  { %390 = vrot.lane.b32.xlu1 %v385_v13, %s798_s20 }
  0xa1   :  { %388 = vrot.lane.b32.xlu0 %v384_v14, %s798_s20 }
  0xa4   :  { %404 = vrot.lane.b32.xlu1 %v399_v16, %s798_s20 }
  0xa5   :  { %402 = vrot.lane.b32.xlu0 %v398_v17, %s798_s20 }
  0xa8   :  { %417 = vrot.lane.b32.xlu1 %v412_v19, %s798_s20 }
  0xa9   :  { %415 = vrot.lane.b32.xlu0 %v411_v20, %s798_s20 }
  0xac   :  { %430 = vrot.lane.b32.xlu1 %v425_v22, %s799_s25 }
  0xad   :  { %428 = vrot.lane.b32.xlu0 %v424_v23, %s799_s25 }
  0xb0   :  { %444 = vrot.lane.b32.xlu1 %v439_v25, %s799_s25 }
  0xb1   :  { %442 = vrot.lane.b32.xlu0 %v438_v26, %s799_s25 }
  0xb2   :  { %v83_v31 = vpop.permute.xlu1 %82 }
  0xb3   :  { %v69_v33 = vpop.permute.xlu0 %68 }
  0xb4   :  { %457 = vrot.lane.b32.xlu1 %v452_v28, %s799_s25 }
  0xb5   :  { %455 = vrot.lane.b32.xlu0 %v451_v29, %s799_s25 }
  0xb6   :  { %v85_v36 = vpop.permute.xlu1 %84 }
  0xb7   :  { %v86_v38 = vsel %vm72_vm0, %v83_v31, %v85_v36  ;;  %v71_v39 = vpop.permute.xlu0 %70 }
  0xb8   :  { %v88_v40 = vadd.f32 %v86_v38, %v58_v34  ;;  %v73_v1 = vsel %vm72_vm0, %v69_v33, %v71_v39 }
  0xb9   :  { %v75_v41 = vadd.f32 %v73_v1, %v55_v35 }
  0xba   :  { %v98_v43 = vpop.permute.xlu1 %97 }
  0xbb   :  { %v96_v44 = vpop.permute.xlu0 %95 }
  0xbc   :  { %v99_v45 = vsel %vm72_vm0, %v96_v44, %v98_v43 }
  0xbd   :  { %v101_v46 = vadd.f32 %v99_v45, %v61_v42  ;;  %v800_v45 = vmov 1966171168  }
  0xbe   :  { %v111_v47 = vpop.permute.xlu1 %110 }
  0xbf   :  { %v109_v48 = vpop.permute.xlu0 %108 }
  0xc0   :  { %v113_v49 = vsel %vm112_vm1, %v109_v48, %v111_v47 }
  0xc1   :  { %v115_v50 = vadd.f32 %v113_v49, %v75_v41  ;;  %v467_v49 = vlaneseq }
  0xc2   :  { %v125_v51 = vpop.permute.xlu1 %124 }
  0xc3   :  { %v123_v52 = vpop.permute.xlu0 %122 }
  0xc4   :  { %v126_v53 = vsel %vm112_vm1, %v123_v52, %v125_v51 }
  0xc5   :  { %v128_v54 = vadd.f32 %v126_v53, %v88_v40 }
  0xc6   :  { %v138_v55 = vpop.permute.xlu1 %137 }
  0xc7   :  { %v136_v56 = vpop.permute.xlu0 %135 }
  0xc8   :  { %v139_v57 = vsel %vm112_vm1, %v136_v56, %v138_v55 }
  0xc9   :  { %v141_v58 = vadd.f32 %v139_v57, %v101_v46  ;;  %v465_v46 = vunpack.c.l.s4 %v800_v45 }
  0xca   :  { %v151_v59 = vpop.permute.xlu1 %150 }
  0xcb   :  { %v149_v0 = vpop.permute.xlu0 %148 }
  0xcc   :  { %v153_v60 = vsel %vm152_vm2, %v149_v0, %v151_v59 }
  0xcd   :  { %v155_v61 = vadd.f32 %v153_v60, %v115_v50 }
  0xce   :  { %v165_v62 = vpop.permute.xlu1 %164 }
  0xcf   :  { %v163_v63 = vpop.permute.xlu0 %162 }
  0xd0   :  { %v166_v2 = vsel %vm152_vm2, %v163_v63, %v165_v62  ;;  %v468_v62 = vshrl.u32 %v467_v49, 7 }
  0xd1   :  { %v168_v3 = vadd.f32 %v166_v2, %v128_v54 }
  0xd2   :  { %v178_v4 = vpop.permute.xlu1 %177 }
  0xd3   :  { %v176_v5 = vpop.permute.xlu0 %175 }
  0xd4   :  { %v179_v6 = vsel %vm152_vm2, %v176_v5, %v178_v4 }
  0xd5   :  { %v925_v7 = vadd.f32 %v179_v6, %v141_v58  ;;  %v466_v58 = vunpack.c.0.s8 %v465_v46 }
  0xd6   :  { %v191_v8 = vpop.permute.xlu1 %190 }
  0xd7   :  { %v189_v9 = vpop.permute.xlu0 %188 }
  0xd8   :  { %v193_v38 = vsel %vm192_vm3, %v189_v9, %v191_v8 }
  0xd9   :  { %v195_v41 = vadd.f32 %v193_v38, %v155_v61 }
  0xda   :  { %v205_v10 = vpop.permute.xlu1 %204 }
  0xdb   :  { %v203_v11 = vpop.permute.xlu0 %202 }
  0xdc   :  { %v206_v42 = vsel %vm192_vm3, %v203_v11, %v205_v10 }
  0xdd   :  { %v208_v52 = vadd.f32 %v206_v42, %v168_v3 }
  0xde   :  { %v218_v12 = vpop.permute.xlu1 %217 }
  0xdf   :  { %v216_v13 = vpop.permute.xlu0 %215 }
  0xe0   :  { %v219_v53 = vsel %vm192_vm3, %v216_v13, %v218_v12 }
  0xe1   :  { %v221_v63 = vadd.f32 %v219_v53, %v925_v7 }
  0xe2   :  { %v231_v14 = vpop.permute.xlu1 %230 }
  0xe3   :  { %v229_v15 = vpop.permute.xlu0 %228 }
  0xe4   :  { %v233_v1 = vsel %vm232_vm4, %v229_v15, %v231_v14  ;;  %v943_v14 = vsub.s32 %v466_v58, %v468_v62 }
  0xe5   :  { %v235_v47 = vadd.f32 %v233_v1, %v195_v41 }
  0xe6   :  { %v245_v16 = vpop.permute.xlu1 %244 }
  0xe7   :  { %v243_v17 = vpop.permute.xlu0 %242 }
  0xe8   :  { %v246_v50 = vsel %vm232_vm4, %v243_v17, %v245_v16 }
  0xe9   :  { %v248_v59 = vadd.f32 %v246_v50, %v208_v52 }
  0xea   :  { %v258_v18 = vpop.permute.xlu1 %257 }
  0xeb   :  { %v256_v19 = vpop.permute.xlu0 %255 }
  0xec   :  { %v259_v0 = vsel %vm232_vm4, %v256_v19, %v258_v18 }
  0xed   :  { %v261_v8 = vadd.f32 %v259_v0, %v221_v63 }
  0xee   :  { %v271_v20 = vpop.permute.xlu1 %270 }
  0xef   :  { %v269_v21 = vpop.permute.xlu0 %268 }
  0xf0   :  { %v273_v43 = vsel %vm272_vm5, %v269_v21, %v271_v20 }
  0xf1   :  { %v275_v54 = vadd.f32 %v273_v43, %v235_v47 }
  0xf2   :  { %v285_v22 = vpop.permute.xlu1 %284 }
  0xf3   :  { %v283_v23 = vpop.permute.xlu0 %282 }
  0xf4   :  { %v286_v55 = vsel %vm272_vm5, %v283_v23, %v285_v22 }
  0xf5   :  { %v288_v4 = vadd.f32 %v286_v55, %v248_v59 }
  0xf6   :  { %v298_v24 = vpop.permute.xlu1 %297 }
  0xf7   :  { %v296_v25 = vpop.permute.xlu0 %295 }
  0xf8   :  { %v299_v5 = vsel %vm272_vm5, %v296_v25, %v298_v24 }
  0xf9   :  { %v301_v15 = vadd.f32 %v299_v5, %v261_v8 }
  0xfa   :  { %v311_v26 = vpop.permute.xlu1 %310 }
  0xfb   :  { %v309_v27 = vpop.permute.xlu0 %308 }
  0xfc   :  { %v313_v51 = vsel %vm312_vm6, %v309_v27, %v311_v26 }
  0xfd   :  { %v315_v60 = vadd.f32 %v313_v51, %v275_v54 }
  0xfe   :  { %v325_v28 = vpop.permute.xlu1 %324 }
  0xff   :  { %v323_v29 = vpop.permute.xlu0 %322 }
 0x100   :  { %v326_v2 = vsel %vm312_vm6, %v323_v29, %v325_v28 }
 0x101   :  { %v328_v11 = vadd.f32 %v326_v2, %v288_v4 }
 0x102   :  { %v338_v30 = vpop.permute.xlu1 %337 }
 0x103   :  { %v336_v31 = vpop.permute.xlu0 %335 }
 0x104   :  { %v339_v12 = vsel %vm312_vm6, %v336_v31, %v338_v30 }
 0x105   :  { %v341_v21 = vadd.f32 %v339_v12, %v301_v15 }
 0x106   :  { %v351_v32 = vpop.permute.xlu1 %350 }
 0x107   :  { %v349_v33 = vpop.permute.xlu0 %348 }
 0x108   :  { %v353_v56 = vsel %vm352_vm7, %v349_v33, %v351_v32 }
 0x109   :  { %v355_v6 = vadd.f32 %v353_v56, %v315_v60 }
 0x10a   :  { %v365_v34 = vpop.permute.xlu1 %364 }
 0x10b   :  { %v363_v35 = vpop.permute.xlu0 %362 }
 0x10c   :  { %v366_v9 = vsel %vm352_vm7, %v363_v35, %v365_v34 }
 0x10d   :  { %v368_v18 = vadd.f32 %v366_v9, %v328_v11 }
 0x10e   :  { %v378_v36 = vpop.permute.xlu1 %377 }
 0x10f   :  { %v376_v37 = vpop.permute.xlu0 %375 }
 0x110   :  { %v379_v19 = vsel %vm352_vm7, %v376_v37, %v378_v36 }
 0x111   :  { %v381_v28 = vadd.f32 %v379_v19, %v341_v21 }
 0x112   :  { %v391_v39 = vpop.permute.xlu1 %390 }
 0x113   :  { %v389_v40 = vpop.permute.xlu0 %388 }
 0x114   :  { %v393_v3 = vsel %vm392_vm8, %v389_v40, %v391_v39 }
 0x115   :  { %v395_v13 = vadd.f32 %v393_v3, %v355_v6 }
 0x116   :  { %v405_v44 = vpop.permute.xlu1 %404 }
 0x117   :  { %v403_v48 = vpop.permute.xlu0 %402 }
 0x118   :  { %v406_v16 = vsel %vm392_vm8, %v403_v48, %v405_v44 }
 0x119   :  { %v408_v23 = vadd.f32 %v406_v16, %v368_v18 }
 0x11a   :  { %v418_v57 = vpop.permute.xlu1 %417 }
 0x11b   :  { %v416_v61 = vpop.permute.xlu0 %415 }
 0x11c   :  { %v419_v24 = vsel %vm392_vm8, %v416_v61, %v418_v57 }
 0x11d   :  { %v421_v34 = vadd.f32 %v419_v24, %v381_v28 }
 0x11e   :  { %v431_v10 = vpop.permute.xlu1 %430 }
 0x11f   :  { %v429_v7 = vpop.permute.xlu0 %428 }
 0x120   :  { %v433_v17 = vsel %vm432_vm9, %v429_v7, %v431_v10 }
 0x121   :  { %v435_v20 = vadd.f32 %v433_v17, %v395_v13 }
 0x122   :  { %v445_v22 = vpop.permute.xlu1 %444 }
 0x123   :  { %v463_v25 = vcombine.high %v435_v20, %v435_v20  ;;  %v470_v26 = vrot.slane %v435_v20, %v943_v14  ;;  %v443_v27 = vpop.permute.xlu0 %442 }
 0x124   :  { %v446_v29 = vsel %vm432_vm9, %v443_v27, %v445_v22 }
 0x125   :  { %v477_v30 = vrot.slane %v463_v25, %v943_v14  ;;  %v478_v31 = vcombine.high %v470_v26, %v470_v26  ;;  %v486_v32 = vrot.slane %v470_v26, %v943_v14  ;;  %699 = vst.sshfl [vmem:[%s1044_s3] sm:$0x1 pattern:$0x73625140] %v470_v26  ;;  %v448_v33 = vadd.f32 %v446_v29, %v408_v23 }
 0x126   :  { %v458_v35 = vpop.permute.xlu1 %457 }
 0x127   :  { %v479_v36 = vcombine.high %v477_v30, %v477_v30  ;;  %v493_v37 = vrot.slane %v477_v30, %v943_v14  ;;  %v500_v38 = vrot.slane %v478_v31, %v943_v14  ;;  %v508_v39 = vcombine.high %v486_v32, %v486_v32  ;;  %700 = vst.sshfl [vmem:[%s1044_s3 + $0x4] sm:$0x1 pattern:$0x73625140] %v478_v31  ;;  %v456_v40 = vpop.permute.xlu0 %455 }
 0x128   :  { %701 = vst.sshfl [vmem:[%s1044_s3 + $0x10] sm:$0x1 pattern:$0x73625140] %v477_v30  ;;  %v529_v1 = vcombine.high %v448_v33, %v448_v33  ;;  %v536_v41 = vrot.slane %v448_v33, %v943_v14  ;;  %v459_v42 = vsel %vm432_vm9, %v456_v40, %v458_v35 }
 0x129   :  { %v507_v43 = vrot.slane %v479_v36, %v943_v14  ;;  %v509_v44 = vcombine.high %v493_v37, %v493_v37  ;;  %v510_v45 = vcombine.high %v500_v38, %v500_v38  ;;  %522 = vst [vmem:[%s1044_s3 + $0x8] sm:$0x1] %v508_v39  ;;  %702 = vst.sshfl [vmem:[%s1044_s3 + $0x14] sm:$0x1 pattern:$0x73625140] %v479_v36 }
 0x12a   :  { %v461_v46 = vadd.f32 %v459_v42, %v421_v34  ;;  %v543_v47 = vrot.slane %v529_v1, %v943_v14  ;;  %v544_v48 = vcombine.high %v536_v41, %v536_v41  ;;  %v552_v49 = vrot.slane %v536_v41, %v943_v14  ;;  %703 = vst.sshfl [vmem:[%s1044_s3 + $0x1] sm:$0x1 pattern:$0x73625140] %v536_v41 }
 0x12b   :  { %v511_v50 = vcombine.high %v507_v43, %v507_v43  ;;  %523 = vst [vmem:[%s1044_s3 + $0xc] sm:$0x1] %v510_v45  ;;  %526 = vst [vmem:[%s1044_s3 + $0x18] sm:$0x1] %v509_v44 }
 0x12c   :  { %v595_v51 = vcombine.high %v461_v46, %v461_v46  ;;  %v602_v52 = vrot.slane %v461_v46, %v943_v14  ;;  %v545_v53 = vcombine.high %v543_v47, %v543_v47  ;;  %v559_v54 = vrot.slane %v543_v47, %v943_v14  ;;  %704 = vst.sshfl [vmem:[%s1044_s3 + $0x5] sm:$0x1 pattern:$0x73625140] %v544_v48 }
 0x12d   :  { %v566_v55 = vrot.slane %v544_v48, %v943_v14  ;;  %v574_v56 = vcombine.high %v552_v49, %v552_v49  ;;  %705 = vst.sshfl [vmem:[%s1044_s3 + $0x11] sm:$0x1 pattern:$0x73625140] %v543_v47  ;;  %527 = vst [vmem:[%s1044_s3 + $0x1c] sm:$0x1] %v511_v50 }
 0x12e   :  { %v609_v57 = vrot.slane %v595_v51, %v943_v14  ;;  %v610_v58 = vcombine.high %v602_v52, %v602_v52  ;;  %v618_v59 = vrot.slane %v602_v52, %v943_v14  ;;  %707 = vst.sshfl [vmem:[%s1044_s3 + $0x2] sm:$0x1 pattern:$0x73625140] %v602_v52  ;;  %v573_v0 = vrot.slane %v545_v53, %v943_v14 }
 0x12f   :  { %v575_v60 = vcombine.high %v559_v54, %v559_v54  ;;  %v576_v61 = vcombine.high %v566_v55, %v566_v55  ;;  %588 = vst [vmem:[%s1044_s3 + $0x9] sm:$0x1] %v574_v56  ;;  %706 = vst.sshfl [vmem:[%s1044_s3 + $0x15] sm:$0x1 pattern:$0x73625140] %v545_v53 }
 0x130   :  { %v611_v62 = vcombine.high %v609_v57, %v609_v57  ;;  %v625_v63 = vrot.slane %v609_v57, %v943_v14  ;;  %v632_v2 = vrot.slane %v610_v58, %v943_v14  ;;  %v640_v3 = vcombine.high %v618_v59, %v618_v59  ;;  %708 = vst.sshfl [vmem:[%s1044_s3 + $0x6] sm:$0x1 pattern:$0x73625140] %v610_v58 }
 0x131   :  { %709 = vst.sshfl [vmem:[%s1044_s3 + $0x12] sm:$0x1 pattern:$0x73625140] %v609_v57  ;;  %v577_v4 = vcombine.high %v573_v0, %v573_v0  ;;  %589 = vst [vmem:[%s1044_s3 + $0xd] sm:$0x1] %v576_v61 }
 0x132   :  { %592 = vst [vmem:[%s1044_s3 + $0x19] sm:$0x1] %v575_v60  ;;  %v639_v5 = vrot.slane %v611_v62, %v943_v14  ;;  %v641_v6 = vcombine.high %v625_v63, %v625_v63  ;;  %v642_v8 = vcombine.high %v632_v2, %v632_v2  ;;  %654 = vst [vmem:[%s1044_s3 + $0xa] sm:$0x1] %v640_v3 }
 0x133   :  { %710 = vst.sshfl [vmem:[%s1044_s3 + $0x16] sm:$0x1 pattern:$0x73625140] %v611_v62  ;;  %593 = vst [vmem:[%s1044_s3 + $0x1d] sm:$0x1] %v577_v4 }
 0x134   :  { %v643_v9 = vcombine.high %v639_v5, %v639_v5  ;;  %655 = vst [vmem:[%s1044_s3 + $0xe] sm:$0x1] %v642_v8  ;;  %658 = vst [vmem:[%s1044_s3 + $0x1a] sm:$0x1] %v641_v6 }
 0x136   :  { %659 = vst [vmem:[%s1044_s3 + $0x1e] sm:$0x1] %v643_v9 }
 0x137   :  { %664 = vsyncpa [#allocation3], 1 }
 0x138   :  { %665 = vsyncpa [#allocation6], 1 }
 0x139   :  { %666 = vsyncpa [#allocation4], 1 }

</bundles_post_ra>
